<compile_context>
chip_gen: v6e
topology: v6e:2x2x1
jax: 0.10.0
libtpu: 0.0.40
codegen_flags: <defaults>
</compile_context>

<pallas_src>
import numpy as np
import jax
import jax.numpy as jnp
from jax.experimental import pallas as pl
from jax.experimental.pallas import tpu as pltpu

HIDDEN = 32   # LSTM hidden size (fixed in the module)
REG_H = 16    # regression hidden size
SUBLANE = 8   # f32 sublane count


def lstm_reg_kernel(x_ref, wih_ref, whh_ref, b_ref, w1_ref, b1_ref, w2_ref, b2_ref,
                    out_ref, gx_sc, h_sc, c_sc):
    """Whole forward in one kernel invocation (no grid).

    Phase 1: one batched input projection for all timesteps.
    Phase 2: serial LSTM recurrence over T (h/c live in VMEM scratch).
    Phase 3: regression head on the final hidden state.
    """
    T, Bp, D = x_ref.shape
    H = HIDDEN

    # --- Phase 1: gates_x = x @ W_ih^T + (b_ih + b_hh), one big MXU push --------
    # (T, Bp, D) -> (T*Bp, D): collapse of major dims (Bp == 8 == sublane tile),
    # layout-trivial reshape.
    x_all = x_ref[...].reshape(T * Bp, D)
    gx = jnp.dot(x_all, wih_ref[...], preferred_element_type=jnp.float32) + b_ref[...]
    gx_sc[...] = gx.reshape(T, Bp, 4 * H)

    h_sc[...] = jnp.zeros_like(h_sc)
    c_sc[...] = jnp.zeros_like(c_sc)

    # --- Phase 2: serial recurrence; only h @ W_hh^T + gate math per step -------
    def step(t, carry):
        gates = gx_sc[t] + jnp.dot(h_sc[...], whh_ref[...],
                                   preferred_element_type=jnp.float32)   # (Bp, 4H)
        i_g = jax.nn.sigmoid(gates[:, 0:H])
        f_g = jax.nn.sigmoid(gates[:, H:2 * H])
        g_g = jnp.tanh(gates[:, 2 * H:3 * H])
        o_g = jax.nn.sigmoid(gates[:, 3 * H:4 * H])
        c_new = f_g * c_sc[...] + i_g * g_g
        h_new = o_g * jnp.tanh(c_new)
        c_sc[...] = c_new
        h_sc[...] = h_new
        return carry

    jax.lax.fori_loop(0, T, step, 0, unroll=True)

    # --- Phase 3: regression head on i_lstm[-1] ---------------------------------
    h = h_sc[...]
    z = jnp.dot(h, w1_ref[...], preferred_element_type=jnp.float32) + b1_ref[...]
    z = jnp.maximum(z, 0.0)
    y = jnp.dot(z, w2_ref[...], preferred_element_type=jnp.float32) + b2_ref[...]
    out_ref[...] = y.astype(out_ref.dtype)


def prototype_model_forward(x, params):
    """x: (T, B, D) float32 -> (B,) prediction (torch.squeeze semantics)."""
    T, B, D = x.shape
    H = HIDDEN

    # Pad batch to a full sublane so every vector op / MXU row is full width.
    Bp = max(SUBLANE, ((B + SUBLANE - 1) // SUBLANE) * SUBLANE)
    if Bp != B:
        x_in = jnp.zeros((T, Bp, D), x.dtype).at[:, :B, :].set(x)
    else:
        x_in = x

    # Pre-transpose weights so the kernel does plain (M,K)@(K,N) matmuls.
    wih_t = params["w_ih"].T                                   # (D, 4H)
    whh_t = params["w_hh"].T                                   # (H, 4H)
    b = (params["b_ih"] + params["b_hh"]).reshape(1, 4 * H)    # fused LSTM bias
    w1_t = params["w1"].T                                      # (H, 16)
    b1 = params["b1"].reshape(1, REG_H)
    w2_t = params["w2"].T                                      # (16, 1)
    b2 = params["b2"].reshape(1, 1)

    vmem = pl.BlockSpec(memory_space=pltpu.MemorySpace.VMEM)   # whole array in VMEM

    # Everything (x, gates_x scratch, weights) is a few tens of KB -- far inside
    # the scoped-VMEM default on every chip; set the limit explicitly anyway.
    cost = pl.CostEstimate(
        flops=2 * T * Bp * 4 * H * (D + H) + 2 * Bp * (H * REG_H + REG_H),
        transcendentals=T * Bp * 5 * H,
        bytes_accessed=4 * (x_in.size + wih_t.size + whh_t.size + b.size
                            + w1_t.size + b1.size + w2_t.size + b2.size + Bp),
    )

    out = pl.pallas_call(
        lstm_reg_kernel,
        out_shape=jax.ShapeDtypeStruct((Bp, 1), jnp.float32),
        in_specs=[vmem] * 8,
        out_specs=vmem,
        scratch_shapes=[
            pltpu.VMEM((T, Bp, 4 * H), jnp.float32),   # gates_x (precomputed input proj)
            pltpu.VMEM((Bp, H), jnp.float32),          # h
            pltpu.VMEM((Bp, H), jnp.float32),          # c
        ],
        cost_estimate=cost,
        compiler_params=pltpu.CompilerParams(vmem_limit_bytes=32 * 1024 * 1024),
    )(x_in, wih_t, whh_t, b, w1_t, b1, w2_t, b2)

    # Drop padded batch rows before squeeze (torch.squeeze semantics).
    return jnp.squeeze(out[:B])


def init_params(key, input_size):
    """Deterministic init matching the module's parameter shapes (PyTorch-style uniform)."""
    ks = jax.random.split(key, 8)
    k_lstm = 1.0 / np.sqrt(HIDDEN)
    k_l1 = 1.0 / np.sqrt(HIDDEN)
    k_l2 = 1.0 / np.sqrt(REG_H)
    u = lambda k, shape, lim: jax.random.uniform(k, shape, jnp.float32, -lim, lim)
    return {
        "w_ih": u(ks[0], (4 * HIDDEN, input_size), k_lstm),
        "w_hh": u(ks[1], (4 * HIDDEN, HIDDEN), k_lstm),
        "b_ih": u(ks[2], (4 * HIDDEN,), k_lstm),
        "b_hh": u(ks[3], (4 * HIDDEN,), k_lstm),
        "w1": u(ks[4], (REG_H, HIDDEN), k_l1),
        "b1": u(ks[5], (REG_H,), k_l1),
        "w2": u(ks[6], (1, REG_H), k_l2),
        "b2": u(ks[7], (1,), k_l2),
    }


def reference_forward(x, params):
    """Pure-JAX reference reproducing the PyTorch forward."""
    T, B, D = x.shape
    H = HIDDEN
    b = params["b_ih"] + params["b_hh"]

    def step(carry, x_t):
        h, c = carry
        gates = x_t @ params["w_ih"].T + h @ params["w_hh"].T + b
        i = jax.nn.sigmoid(gates[:, 0:H])
        f = jax.nn.sigmoid(gates[:, H:2 * H])
        g = jnp.tanh(gates[:, 2 * H:3 * H])
        o = jax.nn.sigmoid(gates[:, 3 * H:4 * H])
        c = f * c + i * g
        h = o * jnp.tanh(c)
        return (h, c), None

    (h, _), _ = jax.lax.scan(step, (jnp.zeros((B, H)), jnp.zeros((B, H))), x)
    z = jnp.maximum(h @ params["w1"].T + params["b1"], 0.0)
    y = z @ params["w2"].T + params["b2"]
    return jnp.squeeze(y)


if __name__ == "__main__":
    T, B, D = 8, 2, 8   # seq=8, batch=2, input_size=8
    key = jax.random.PRNGKey(0)
    k_param, k_data = jax.random.split(key)
    params = init_params(k_param, D)
    x = jax.random.normal(k_data, (T, B, D), jnp.float32)

    pred = jax.block_until_ready(prototype_model_forward(x, params))

    ref = reference_forward(x, params)
    assert pred.shape == ref.shape == (B,)
    np.testing.assert_allclose(np.asarray(pred), np.asarray(ref), rtol=1e-5, atol=1e-5)
    print("KERNEL_OK")
</pallas_src>

<mosaic_0001>
module attributes {stable_mosaic.version = 11 : i64} {
  func.func @lstm_reg_kernel(%arg0: memref<8x8x8xf32, #tpu.memory_space<vmem>>, %arg1: memref<8x128xf32, #tpu.memory_space<vmem>>, %arg2: memref<32x128xf32, #tpu.memory_space<vmem>>, %arg3: memref<1x128xf32, #tpu.memory_space<vmem>>, %arg4: memref<32x16xf32, #tpu.memory_space<vmem>>, %arg5: memref<1x16xf32, #tpu.memory_space<vmem>>, %arg6: memref<16x1xf32, #tpu.memory_space<vmem>>, %arg7: memref<1x1xf32, #tpu.memory_space<vmem>>, %arg8: memref<8x1xf32, #tpu.memory_space<vmem>>, %arg9: memref<8x8x128xf32, #tpu.memory_space<vmem>>, %arg10: memref<8x32xf32, #tpu.memory_space<vmem>>, %arg11: memref<8x32xf32, #tpu.memory_space<vmem>>) attributes {dimension_semantics = [], scalar_prefetch = 0 : i64, scratch_operands = 3 : i64, tpu.core_type = #tpu.core_type<tc>} {
    %c0 = arith.constant 0 : index
    %c0_0 = arith.constant 0 : index
    %c0_1 = arith.constant 0 : index
    %0 = vector.load %arg0[%c0, %c0_0, %c0_1] : memref<8x8x8xf32, #tpu.memory_space<vmem>>, vector<8x8x8xf32>
    %1 = vector.shape_cast %0 : vector<8x8x8xf32> to vector<64x8xf32>
    %c0_2 = arith.constant 0 : index
    %c0_3 = arith.constant 0 : index
    %2 = vector.load %arg1[%c0_2, %c0_3] : memref<8x128xf32, #tpu.memory_space<vmem>>, vector<8x128xf32>
    %cst = arith.constant dense<0.000000e+00> : vector<64x128xf32>
    %3 = tpu.matmul %1, %2, %cst {dimension_numbers = #tpu.dot_dimension_numbers<[1], [0], [0], [1], [0, 0, 1, 1], [], []>} : vector<64x8xf32>, vector<8x128xf32>, vector<64x128xf32> -> vector<64x128xf32>
    %c0_4 = arith.constant 0 : index
    %c0_5 = arith.constant 0 : index
    %4 = vector.load %arg3[%c0_4, %c0_5] : memref<1x128xf32, #tpu.memory_space<vmem>>, vector<1x128xf32>
    %5 = vector.broadcast %4 : vector<1x128xf32> to vector<64x128xf32>
    %6 = arith.addf %3, %5 : vector<64x128xf32>
    %7 = vector.shape_cast %6 : vector<64x128xf32> to vector<8x8x128xf32>
    %c0_6 = arith.constant 0 : index
    %c0_7 = arith.constant 0 : index
    %c0_8 = arith.constant 0 : index
    %8 = vector.load %arg9[%c0_6, %c0_7, %c0_8] : memref<8x8x128xf32, #tpu.memory_space<vmem>>, vector<8x8x128xf32>
    tpu.vector_store %arg9[%c0_6, %c0_7, %c0_8], %7 {strides = array<i32>} : memref<8x8x128xf32, #tpu.memory_space<vmem>>, vector<8x8x128xf32>,
    %cst_9 = arith.constant 0.000000e+00 : f32
    %9 = vector.broadcast %cst_9 : f32 to vector<8x32xf32>
    %c0_10 = arith.constant 0 : index
    %c0_11 = arith.constant 0 : index
    %10 = vector.load %arg10[%c0_10, %c0_11] : memref<8x32xf32, #tpu.memory_space<vmem>>, vector<8x32xf32>
    tpu.vector_store %arg10[%c0_10, %c0_11], %9 {strides = array<i32>} : memref<8x32xf32, #tpu.memory_space<vmem>>, vector<8x32xf32>,
    %cst_12 = arith.constant 0.000000e+00 : f32
    %11 = vector.broadcast %cst_12 : f32 to vector<8x32xf32>
    %c0_13 = arith.constant 0 : index
    %c0_14 = arith.constant 0 : index
    %12 = vector.load %arg11[%c0_13, %c0_14] : memref<8x32xf32, #tpu.memory_space<vmem>>, vector<8x32xf32>
    tpu.vector_store %arg11[%c0_13, %c0_14], %11 {strides = array<i32>} : memref<8x32xf32, #tpu.memory_space<vmem>>, vector<8x32xf32>,
    %c0_i32 = arith.constant 0 : i32
    %13 = arith.index_cast %c0_i32 : i32 to index
    %c0_15 = arith.constant 0 : index
    %c0_16 = arith.constant 0 : index
    %14 = vector.load %arg9[%13, %c0_15, %c0_16] : memref<8x8x128xf32, #tpu.memory_space<vmem>>, vector<1x8x128xf32>
    %15 = vector.shape_cast %14 : vector<1x8x128xf32> to vector<8x128xf32>
    %c0_17 = arith.constant 0 : index
    %c0_18 = arith.constant 0 : index
    %16 = vector.load %arg10[%c0_17, %c0_18] : memref<8x32xf32, #tpu.memory_space<vmem>>, vector<8x32xf32>
    %c0_19 = arith.constant 0 : index
    %c0_20 = arith.constant 0 : index
    %17 = vector.load %arg2[%c0_19, %c0_20] : memref<32x128xf32, #tpu.memory_space<vmem>>, vector<32x128xf32>
    %cst_21 = arith.constant dense<0.000000e+00> : vector<8x128xf32>
    %18 = tpu.matmul %16, %17, %cst_21 {dimension_numbers = #tpu.dot_dimension_numbers<[1], [0], [0], [1], [0, 0, 1, 1], [], []>} : vector<8x32xf32>, vector<32x128xf32>, vector<8x128xf32> -> vector<8x128xf32>
    %19 = arith.addf %15, %18 : vector<8x128xf32>
    %20 = vector.extract_strided_slice %19 {offsets = [0, 0], sizes = [8, 32], strides = [1, 1]} : vector<8x128xf32> to vector<8x32xf32>
    %21 = arith.negf %20 : vector<8x32xf32>
    %22 = math.exp %21 : vector<8x32xf32>
    %cst_22 = arith.constant 1.000000e+00 : f32
    %23 = vector.broadcast %cst_22 : f32 to vector<8x32xf32>
    %24 = arith.addf %23, %22 : vector<8x32xf32>
    %25 = arith.divf %23, %24 : vector<8x32xf32>
    %26 = vector.extract_strided_slice %19 {offsets = [0, 32], sizes = [8, 32], strides = [1, 1]} : vector<8x128xf32> to vector<8x32xf32>
    %27 = arith.negf %26 : vector<8x32xf32>
    %28 = math.exp %27 : vector<8x32xf32>
    %cst_23 = arith.constant 1.000000e+00 : f32
    %29 = vector.broadcast %cst_23 : f32 to vector<8x32xf32>
    %30 = arith.addf %29, %28 : vector<8x32xf32>
    %31 = arith.divf %29, %30 : vector<8x32xf32>
    %32 = vector.extract_strided_slice %19 {offsets = [0, 64], sizes = [8, 32], strides = [1, 1]} : vector<8x128xf32> to vector<8x32xf32>
    %33 = math.tanh %32 : vector<8x32xf32>
    %34 = vector.extract_strided_slice %19 {offsets = [0, 96], sizes = [8, 32], strides = [1, 1]} : vector<8x128xf32> to vector<8x32xf32>
    %35 = arith.negf %34 : vector<8x32xf32>
    %36 = math.exp %35 : vector<8x32xf32>
    %cst_24 = arith.constant 1.000000e+00 : f32
    %37 = vector.broadcast %cst_24 : f32 to vector<8x32xf32>
    %38 = arith.addf %37, %36 : vector<8x32xf32>
    %39 = arith.divf %37, %38 : vector<8x32xf32>
    %c0_25 = arith.constant 0 : index
    %c0_26 = arith.constant 0 : index
    %40 = vector.load %arg11[%c0_25, %c0_26] : memref<8x32xf32, #tpu.memory_space<vmem>>, vector<8x32xf32>
    %41 = arith.mulf %31, %40 : vector<8x32xf32>
    %42 = arith.mulf %25, %33 : vector<8x32xf32>
    %43 = arith.addf %41, %42 : vector<8x32xf32>
    %44 = math.tanh %43 : vector<8x32xf32>
    %45 = arith.mulf %39, %44 : vector<8x32xf32>
    %c0_27 = arith.constant 0 : index
    %c0_28 = arith.constant 0 : index
    %46 = vector.load %arg11[%c0_27, %c0_28] : memref<8x32xf32, #tpu.memory_space<vmem>>, vector<8x32xf32>
    tpu.vector_store %arg11[%c0_27, %c0_28], %43 {strides = array<i32>} : memref<8x32xf32, #tpu.memory_space<vmem>>, vector<8x32xf32>,
    %c0_29 = arith.constant 0 : index
    %c0_30 = arith.constant 0 : index
    %47 = vector.load %arg10[%c0_29, %c0_30] : memref<8x32xf32, #tpu.memory_space<vmem>>, vector<8x32xf32>
    tpu.vector_store %arg10[%c0_29, %c0_30], %45 {strides = array<i32>} : memref<8x32xf32, #tpu.memory_space<vmem>>, vector<8x32xf32>,
    %c1_i32 = arith.constant 1 : i32
    %48 = arith.index_cast %c1_i32 : i32 to index
    %c0_31 = arith.constant 0 : index
    %c0_32 = arith.constant 0 : index
    %49 = vector.load %arg9[%48, %c0_31, %c0_32] : memref<8x8x128xf32, #tpu.memory_space<vmem>>, vector<1x8x128xf32>
    %50 = vector.shape_cast %49 : vector<1x8x128xf32> to vector<8x128xf32>
    %c0_33 = arith.constant 0 : index
    %c0_34 = arith.constant 0 : index
    %51 = vector.load %arg10[%c0_33, %c0_34] : memref<8x32xf32, #tpu.memory_space<vmem>>, vector<8x32xf32>
    %c0_35 = arith.constant 0 : index
    %c0_36 = arith.constant 0 : index
    %52 = vector.load %arg2[%c0_35, %c0_36] : memref<32x128xf32, #tpu.memory_space<vmem>>, vector<32x128xf32>
    %cst_37 = arith.constant dense<0.000000e+00> : vector<8x128xf32>
    %53 = tpu.matmul %51, %52, %cst_37 {dimension_numbers = #tpu.dot_dimension_numbers<[1], [0], [0], [1], [0, 0, 1, 1], [], []>} : vector<8x32xf32>, vector<32x128xf32>, vector<8x128xf32> -> vector<8x128xf32>
    %54 = arith.addf %50, %53 : vector<8x128xf32>
    %55 = vector.extract_strided_slice %54 {offsets = [0, 0], sizes = [8, 32], strides = [1, 1]} : vector<8x128xf32> to vector<8x32xf32>
    %56 = arith.negf %55 : vector<8x32xf32>
    %57 = math.exp %56 : vector<8x32xf32>
    %cst_38 = arith.constant 1.000000e+00 : f32
    %58 = vector.broadcast %cst_38 : f32 to vector<8x32xf32>
    %59 = arith.addf %58, %57 : vector<8x32xf32>
    %60 = arith.divf %58, %59 : vector<8x32xf32>
    %61 = vector.extract_strided_slice %54 {offsets = [0, 32], sizes = [8, 32], strides = [1, 1]} : vector<8x128xf32> to vector<8x32xf32>
    %62 = arith.negf %61 : vector<8x32xf32>
    %63 = math.exp %62 : vector<8x32xf32>
    %cst_39 = arith.constant 1.000000e+00 : f32
    %64 = vector.broadcast %cst_39 : f32 to vector<8x32xf32>
    %65 = arith.addf %64, %63 : vector<8x32xf32>
    %66 = arith.divf %64, %65 : vector<8x32xf32>
    %67 = vector.extract_strided_slice %54 {offsets = [0, 64], sizes = [8, 32], strides = [1, 1]} : vector<8x128xf32> to vector<8x32xf32>
    %68 = math.tanh %67 : vector<8x32xf32>
    %69 = vector.extract_strided_slice %54 {offsets = [0, 96], sizes = [8, 32], strides = [1, 1]} : vector<8x128xf32> to vector<8x32xf32>
    %70 = arith.negf %69 : vector<8x32xf32>
    %71 = math.exp %70 : vector<8x32xf32>
    %cst_40 = arith.constant 1.000000e+00 : f32
    %72 = vector.broadcast %cst_40 : f32 to vector<8x32xf32>
    %73 = arith.addf %72, %71 : vector<8x32xf32>
    %74 = arith.divf %72, %73 : vector<8x32xf32>
    %c0_41 = arith.constant 0 : index
    %c0_42 = arith.constant 0 : index
    %75 = vector.load %arg11[%c0_41, %c0_42] : memref<8x32xf32, #tpu.memory_space<vmem>>, vector<8x32xf32>
    %76 = arith.mulf %66, %75 : vector<8x32xf32>
    %77 = arith.mulf %60, %68 : vector<8x32xf32>
    %78 = arith.addf %76, %77 : vector<8x32xf32>
    %79 = math.tanh %78 : vector<8x32xf32>
    %80 = arith.mulf %74, %79 : vector<8x32xf32>
    %c0_43 = arith.constant 0 : index
    %c0_44 = arith.constant 0 : index
    %81 = vector.load %arg11[%c0_43, %c0_44] : memref<8x32xf32, #tpu.memory_space<vmem>>, vector<8x32xf32>
    tpu.vector_store %arg11[%c0_43, %c0_44], %78 {strides = array<i32>} : memref<8x32xf32, #tpu.memory_space<vmem>>, vector<8x32xf32>,
    %c0_45 = arith.constant 0 : index
    %c0_46 = arith.constant 0 : index
    %82 = vector.load %arg10[%c0_45, %c0_46] : memref<8x32xf32, #tpu.memory_space<vmem>>, vector<8x32xf32>
    tpu.vector_store %arg10[%c0_45, %c0_46], %80 {strides = array<i32>} : memref<8x32xf32, #tpu.memory_space<vmem>>, vector<8x32xf32>,
    %c2_i32 = arith.constant 2 : i32
    %83 = arith.index_cast %c2_i32 : i32 to index
    %c0_47 = arith.constant 0 : index
    %c0_48 = arith.constant 0 : index
    %84 = vector.load %arg9[%83, %c0_47, %c0_48] : memref<8x8x128xf32, #tpu.memory_space<vmem>>, vector<1x8x128xf32>
    %85 = vector.shape_cast %84 : vector<1x8x128xf32> to vector<8x128xf32>
    %c0_49 = arith.constant 0 : index
    %c0_50 = arith.constant 0 : index
    %86 = vector.load %arg10[%c0_49, %c0_50] : memref<8x32xf32, #tpu.memory_space<vmem>>, vector<8x32xf32>
    %c0_51 = arith.constant 0 : index
    %c0_52 = arith.constant 0 : index
    %87 = vector.load %arg2[%c0_51, %c0_52] : memref<32x128xf32, #tpu.memory_space<vmem>>, vector<32x128xf32>
    %cst_53 = arith.constant dense<0.000000e+00> : vector<8x128xf32>
    %88 = tpu.matmul %86, %87, %cst_53 {dimension_numbers = #tpu.dot_dimension_numbers<[1], [0], [0], [1], [0, 0, 1, 1], [], []>} : vector<8x32xf32>, vector<32x128xf32>, vector<8x128xf32> -> vector<8x128xf32>
    %89 = arith.addf %85, %88 : vector<8x128xf32>
    %90 = vector.extract_strided_slice %89 {offsets = [0, 0], sizes = [8, 32], strides = [1, 1]} : vector<8x128xf32> to vector<8x32xf32>
    %91 = arith.negf %90 : vector<8x32xf32>
    %92 = math.exp %91 : vector<8x32xf32>
    %cst_54 = arith.constant 1.000000e+00 : f32
    %93 = vector.broadcast %cst_54 : f32 to vector<8x32xf32>
    %94 = arith.addf %93, %92 : vector<8x32xf32>
    %95 = arith.divf %93, %94 : vector<8x32xf32>
    %96 = vector.extract_strided_slice %89 {offsets = [0, 32], sizes = [8, 32], strides = [1, 1]} : vector<8x128xf32> to vector<8x32xf32>
    %97 = arith.negf %96 : vector<8x32xf32>
    %98 = math.exp %97 : vector<8x32xf32>
    %cst_55 = arith.constant 1.000000e+00 : f32
    %99 = vector.broadcast %cst_55 : f32 to vector<8x32xf32>
    %100 = arith.addf %99, %98 : vector<8x32xf32>
    %101 = arith.divf %99, %100 : vector<8x32xf32>
    %102 = vector.extract_strided_slice %89 {offsets = [0, 64], sizes = [8, 32], strides = [1, 1]} : vector<8x128xf32> to vector<8x32xf32>
    %103 = math.tanh %102 : vector<8x32xf32>
    %104 = vector.extract_strided_slice %89 {offsets = [0, 96], sizes = [8, 32], strides = [1, 1]} : vector<8x128xf32> to vector<8x32xf32>
    %105 = arith.negf %104 : vector<8x32xf32>
    %106 = math.exp %105 : vector<8x32xf32>
    %cst_56 = arith.constant 1.000000e+00 : f32
    %107 = vector.broadcast %cst_56 : f32 to vector<8x32xf32>
    %108 = arith.addf %107, %106 : vector<8x32xf32>
    %109 = arith.divf %107, %108 : vector<8x32xf32>
    %c0_57 = arith.constant 0 : index
    %c0_58 = arith.constant 0 : index
    %110 = vector.load %arg11[%c0_57, %c0_58] : memref<8x32xf32, #tpu.memory_space<vmem>>, vector<8x32xf32>
    %111 = arith.mulf %101, %110 : vector<8x32xf32>
    %112 = arith.mulf %95, %103 : vector<8x32xf32>
    %113 = arith.addf %111, %112 : vector<8x32xf32>
    %114 = math.tanh %113 : vector<8x32xf32>
    %115 = arith.mulf %109, %114 : vector<8x32xf32>
    %c0_59 = arith.constant 0 : index
    %c0_60 = arith.constant 0 : index
    %116 = vector.load %arg11[%c0_59, %c0_60] : memref<8x32xf32, #tpu.memory_space<vmem>>, vector<8x32xf32>
    tpu.vector_store %arg11[%c0_59, %c0_60], %113 {strides = array<i32>} : memref<8x32xf32, #tpu.memory_space<vmem>>, vector<8x32xf32>,
    %c0_61 = arith.constant 0 : index
    %c0_62 = arith.constant 0 : index
    %117 = vector.load %arg10[%c0_61, %c0_62] : memref<8x32xf32, #tpu.memory_space<vmem>>, vector<8x32xf32>
    tpu.vector_store %arg10[%c0_61, %c0_62], %115 {strides = array<i32>} : memref<8x32xf32, #tpu.memory_space<vmem>>, vector<8x32xf32>,
    %c3_i32 = arith.constant 3 : i32
    %118 = arith.index_cast %c3_i32 : i32 to index
    %c0_63 = arith.constant 0 : index
    %c0_64 = arith.constant 0 : index
    %119 = vector.load %arg9[%118, %c0_63, %c0_64] : memref<8x8x128xf32, #tpu.memory_space<vmem>>, vector<1x8x128xf32>
    %120 = vector.shape_cast %119 : vector<1x8x128xf32> to vector<8x128xf32>
    %c0_65 = arith.constant 0 : index
    %c0_66 = arith.constant 0 : index
    %121 = vector.load %arg10[%c0_65, %c0_66] : memref<8x32xf32, #tpu.memory_space<vmem>>, vector<8x32xf32>
    %c0_67 = arith.constant 0 : index
    %c0_68 = arith.constant 0 : index
    %122 = vector.load %arg2[%c0_67, %c0_68] : memref<32x128xf32, #tpu.memory_space<vmem>>, vector<32x128xf32>
    %cst_69 = arith.constant dense<0.000000e+00> : vector<8x128xf32>
    %123 = tpu.matmul %121, %122, %cst_69 {dimension_numbers = #tpu.dot_dimension_numbers<[1], [0], [0], [1], [0, 0, 1, 1], [], []>} : vector<8x32xf32>, vector<32x128xf32>, vector<8x128xf32> -> vector<8x128xf32>
    %124 = arith.addf %120, %123 : vector<8x128xf32>
    %125 = vector.extract_strided_slice %124 {offsets = [0, 0], sizes = [8, 32], strides = [1, 1]} : vector<8x128xf32> to vector<8x32xf32>
    %126 = arith.negf %125 : vector<8x32xf32>
    %127 = math.exp %126 : vector<8x32xf32>
    %cst_70 = arith.constant 1.000000e+00 : f32
    %128 = vector.broadcast %cst_70 : f32 to vector<8x32xf32>
    %129 = arith.addf %128, %127 : vector<8x32xf32>
    %130 = arith.divf %128, %129 : vector<8x32xf32>
    %131 = vector.extract_strided_slice %124 {offsets = [0, 32], sizes = [8, 32], strides = [1, 1]} : vector<8x128xf32> to vector<8x32xf32>
    %132 = arith.negf %131 : vector<8x32xf32>
    %133 = math.exp %132 : vector<8x32xf32>
    %cst_71 = arith.constant 1.000000e+00 : f32
    %134 = vector.broadcast %cst_71 : f32 to vector<8x32xf32>
    %135 = arith.addf %134, %133 : vector<8x32xf32>
    %136 = arith.divf %134, %135 : vector<8x32xf32>
    %137 = vector.extract_strided_slice %124 {offsets = [0, 64], sizes = [8, 32], strides = [1, 1]} : vector<8x128xf32> to vector<8x32xf32>
    %138 = math.tanh %137 : vector<8x32xf32>
    %139 = vector.extract_strided_slice %124 {offsets = [0, 96], sizes = [8, 32], strides = [1, 1]} : vector<8x128xf32> to vector<8x32xf32>
    %140 = arith.negf %139 : vector<8x32xf32>
    %141 = math.exp %140 : vector<8x32xf32>
    %cst_72 = arith.constant 1.000000e+00 : f32
    %142 = vector.broadcast %cst_72 : f32 to vector<8x32xf32>
    %143 = arith.addf %142, %141 : vector<8x32xf32>
    %144 = arith.divf %142, %143 : vector<8x32xf32>
    %c0_73 = arith.constant 0 : index
    %c0_74 = arith.constant 0 : index
    %145 = vector.load %arg11[%c0_73, %c0_74] : memref<8x32xf32, #tpu.memory_space<vmem>>, vector<8x32xf32>
    %146 = arith.mulf %136, %145 : vector<8x32xf32>
    %147 = arith.mulf %130, %138 : vector<8x32xf32>
    %148 = arith.addf %146, %147 : vector<8x32xf32>
    %149 = math.tanh %148 : vector<8x32xf32>
    %150 = arith.mulf %144, %149 : vector<8x32xf32>
    %c0_75 = arith.constant 0 : index
    %c0_76 = arith.constant 0 : index
    %151 = vector.load %arg11[%c0_75, %c0_76] : memref<8x32xf32, #tpu.memory_space<vmem>>, vector<8x32xf32>
    tpu.vector_store %arg11[%c0_75, %c0_76], %148 {strides = array<i32>} : memref<8x32xf32, #tpu.memory_space<vmem>>, vector<8x32xf32>,
    %c0_77 = arith.constant 0 : index
    %c0_78 = arith.constant 0 : index
    %152 = vector.load %arg10[%c0_77, %c0_78] : memref<8x32xf32, #tpu.memory_space<vmem>>, vector<8x32xf32>
    tpu.vector_store %arg10[%c0_77, %c0_78], %150 {strides = array<i32>} : memref<8x32xf32, #tpu.memory_space<vmem>>, vector<8x32xf32>,
    %c4_i32 = arith.constant 4 : i32
    %153 = arith.index_cast %c4_i32 : i32 to index
    %c0_79 = arith.constant 0 : index
    %c0_80 = arith.constant 0 : index
    %154 = vector.load %arg9[%153, %c0_79, %c0_80] : memref<8x8x128xf32, #tpu.memory_space<vmem>>, vector<1x8x128xf32>
    %155 = vector.shape_cast %154 : vector<1x8x128xf32> to vector<8x128xf32>
    %c0_81 = arith.constant 0 : index
    %c0_82 = arith.constant 0 : index
    %156 = vector.load %arg10[%c0_81, %c0_82] : memref<8x32xf32, #tpu.memory_space<vmem>>, vector<8x32xf32>
    %c0_83 = arith.constant 0 : index
    %c0_84 = arith.constant 0 : index
    %157 = vector.load %arg2[%c0_83, %c0_84] : memref<32x128xf32, #tpu.memory_space<vmem>>, vector<32x128xf32>
    %cst_85 = arith.constant dense<0.000000e+00> : vector<8x128xf32>
    %158 = tpu.matmul %156, %157, %cst_85 {dimension_numbers = #tpu.dot_dimension_numbers<[1], [0], [0], [1], [0, 0, 1, 1], [], []>} : vector<8x32xf32>, vector<32x128xf32>, vector<8x128xf32> -> vector<8x128xf32>
    %159 = arith.addf %155, %158 : vector<8x128xf32>
    %160 = vector.extract_strided_slice %159 {offsets = [0, 0], sizes = [8, 32], strides = [1, 1]} : vector<8x128xf32> to vector<8x32xf32>
    %161 = arith.negf %160 : vector<8x32xf32>
    %162 = math.exp %161 : vector<8x32xf32>
    %cst_86 = arith.constant 1.000000e+00 : f32
    %163 = vector.broadcast %cst_86 : f32 to vector<8x32xf32>
    %164 = arith.addf %163, %162 : vector<8x32xf32>
    %165 = arith.divf %163, %164 : vector<8x32xf32>
    %166 = vector.extract_strided_slice %159 {offsets = [0, 32], sizes = [8, 32], strides = [1, 1]} : vector<8x128xf32> to vector<8x32xf32>
    %167 = arith.negf %166 : vector<8x32xf32>
    %168 = math.exp %167 : vector<8x32xf32>
    %cst_87 = arith.constant 1.000000e+00 : f32
    %169 = vector.broadcast %cst_87 : f32 to vector<8x32xf32>
    %170 = arith.addf %169, %168 : vector<8x32xf32>
    %171 = arith.divf %169, %170 : vector<8x32xf32>
    %172 = vector.extract_strided_slice %159 {offsets = [0, 64], sizes = [8, 32], strides = [1, 1]} : vector<8x128xf32> to vector<8x32xf32>
    %173 = math.tanh %172 : vector<8x32xf32>
    %174 = vector.extract_strided_slice %159 {offsets = [0, 96], sizes = [8, 32], strides = [1, 1]} : vector<8x128xf32> to vector<8x32xf32>
    %175 = arith.negf %174 : vector<8x32xf32>
    %176 = math.exp %175 : vector<8x32xf32>
    %cst_88 = arith.constant 1.000000e+00 : f32
    %177 = vector.broadcast %cst_88 : f32 to vector<8x32xf32>
    %178 = arith.addf %177, %176 : vector<8x32xf32>
    %179 = arith.divf %177, %178 : vector<8x32xf32>
    %c0_89 = arith.constant 0 : index
    %c0_90 = arith.constant 0 : index
    %180 = vector.load %arg11[%c0_89, %c0_90] : memref<8x32xf32, #tpu.memory_space<vmem>>, vector<8x32xf32>
    %181 = arith.mulf %171, %180 : vector<8x32xf32>
    %182 = arith.mulf %165, %173 : vector<8x32xf32>
    %183 = arith.addf %181, %182 : vector<8x32xf32>
    %184 = math.tanh %183 : vector<8x32xf32>
    %185 = arith.mulf %179, %184 : vector<8x32xf32>
    %c0_91 = arith.constant 0 : index
    %c0_92 = arith.constant 0 : index
    %186 = vector.load %arg11[%c0_91, %c0_92] : memref<8x32xf32, #tpu.memory_space<vmem>>, vector<8x32xf32>
    tpu.vector_store %arg11[%c0_91, %c0_92], %183 {strides = array<i32>} : memref<8x32xf32, #tpu.memory_space<vmem>>, vector<8x32xf32>,
    %c0_93 = arith.constant 0 : index
    %c0_94 = arith.constant 0 : index
    %187 = vector.load %arg10[%c0_93, %c0_94] : memref<8x32xf32, #tpu.memory_space<vmem>>, vector<8x32xf32>
    tpu.vector_store %arg10[%c0_93, %c0_94], %185 {strides = array<i32>} : memref<8x32xf32, #tpu.memory_space<vmem>>, vector<8x32xf32>,
    %c5_i32 = arith.constant 5 : i32
    %188 = arith.index_cast %c5_i32 : i32 to index
    %c0_95 = arith.constant 0 : index
    %c0_96 = arith.constant 0 : index
    %189 = vector.load %arg9[%188, %c0_95, %c0_96] : memref<8x8x128xf32, #tpu.memory_space<vmem>>, vector<1x8x128xf32>
    %190 = vector.shape_cast %189 : vector<1x8x128xf32> to vector<8x128xf32>
    %c0_97 = arith.constant 0 : index
    %c0_98 = arith.constant 0 : index
    %191 = vector.load %arg10[%c0_97, %c0_98] : memref<8x32xf32, #tpu.memory_space<vmem>>, vector<8x32xf32>
    %c0_99 = arith.constant 0 : index
    %c0_100 = arith.constant 0 : index
    %192 = vector.load %arg2[%c0_99, %c0_100] : memref<32x128xf32, #tpu.memory_space<vmem>>, vector<32x128xf32>
    %cst_101 = arith.constant dense<0.000000e+00> : vector<8x128xf32>
    %193 = tpu.matmul %191, %192, %cst_101 {dimension_numbers = #tpu.dot_dimension_numbers<[1], [0], [0], [1], [0, 0, 1, 1], [], []>} : vector<8x32xf32>, vector<32x128xf32>, vector<8x128xf32> -> vector<8x128xf32>
    %194 = arith.addf %190, %193 : vector<8x128xf32>
    %195 = vector.extract_strided_slice %194 {offsets = [0, 0], sizes = [8, 32], strides = [1, 1]} : vector<8x128xf32> to vector<8x32xf32>
    %196 = arith.negf %195 : vector<8x32xf32>
    %197 = math.exp %196 : vector<8x32xf32>
    %cst_102 = arith.constant 1.000000e+00 : f32
    %198 = vector.broadcast %cst_102 : f32 to vector<8x32xf32>
    %199 = arith.addf %198, %197 : vector<8x32xf32>
    %200 = arith.divf %198, %199 : vector<8x32xf32>
    %201 = vector.extract_strided_slice %194 {offsets = [0, 32], sizes = [8, 32], strides = [1, 1]} : vector<8x128xf32> to vector<8x32xf32>
    %202 = arith.negf %201 : vector<8x32xf32>
    %203 = math.exp %202 : vector<8x32xf32>
    %cst_103 = arith.constant 1.000000e+00 : f32
    %204 = vector.broadcast %cst_103 : f32 to vector<8x32xf32>
    %205 = arith.addf %204, %203 : vector<8x32xf32>
    %206 = arith.divf %204, %205 : vector<8x32xf32>
    %207 = vector.extract_strided_slice %194 {offsets = [0, 64], sizes = [8, 32], strides = [1, 1]} : vector<8x128xf32> to vector<8x32xf32>
    %208 = math.tanh %207 : vector<8x32xf32>
    %209 = vector.extract_strided_slice %194 {offsets = [0, 96], sizes = [8, 32], strides = [1, 1]} : vector<8x128xf32> to vector<8x32xf32>
    %210 = arith.negf %209 : vector<8x32xf32>
    %211 = math.exp %210 : vector<8x32xf32>
    %cst_104 = arith.constant 1.000000e+00 : f32
    %212 = vector.broadcast %cst_104 : f32 to vector<8x32xf32>
    %213 = arith.addf %212, %211 : vector<8x32xf32>
    %214 = arith.divf %212, %213 : vector<8x32xf32>
    %c0_105 = arith.constant 0 : index
    %c0_106 = arith.constant 0 : index
    %215 = vector.load %arg11[%c0_105, %c0_106] : memref<8x32xf32, #tpu.memory_space<vmem>>, vector<8x32xf32>
    %216 = arith.mulf %206, %215 : vector<8x32xf32>
    %217 = arith.mulf %200, %208 : vector<8x32xf32>
    %218 = arith.addf %216, %217 : vector<8x32xf32>
    %219 = math.tanh %218 : vector<8x32xf32>
    %220 = arith.mulf %214, %219 : vector<8x32xf32>
    %c0_107 = arith.constant 0 : index
    %c0_108 = arith.constant 0 : index
    %221 = vector.load %arg11[%c0_107, %c0_108] : memref<8x32xf32, #tpu.memory_space<vmem>>, vector<8x32xf32>
    tpu.vector_store %arg11[%c0_107, %c0_108], %218 {strides = array<i32>} : memref<8x32xf32, #tpu.memory_space<vmem>>, vector<8x32xf32>,
    %c0_109 = arith.constant 0 : index
    %c0_110 = arith.constant 0 : index
    %222 = vector.load %arg10[%c0_109, %c0_110] : memref<8x32xf32, #tpu.memory_space<vmem>>, vector<8x32xf32>
    tpu.vector_store %arg10[%c0_109, %c0_110], %220 {strides = array<i32>} : memref<8x32xf32, #tpu.memory_space<vmem>>, vector<8x32xf32>,
    %c6_i32 = arith.constant 6 : i32
    %223 = arith.index_cast %c6_i32 : i32 to index
    %c0_111 = arith.constant 0 : index
    %c0_112 = arith.constant 0 : index
    %224 = vector.load %arg9[%223, %c0_111, %c0_112] : memref<8x8x128xf32, #tpu.memory_space<vmem>>, vector<1x8x128xf32>
    %225 = vector.shape_cast %224 : vector<1x8x128xf32> to vector<8x128xf32>
    %c0_113 = arith.constant 0 : index
    %c0_114 = arith.constant 0 : index
    %226 = vector.load %arg10[%c0_113, %c0_114] : memref<8x32xf32, #tpu.memory_space<vmem>>, vector<8x32xf32>
    %c0_115 = arith.constant 0 : index
    %c0_116 = arith.constant 0 : index
    %227 = vector.load %arg2[%c0_115, %c0_116] : memref<32x128xf32, #tpu.memory_space<vmem>>, vector<32x128xf32>
    %cst_117 = arith.constant dense<0.000000e+00> : vector<8x128xf32>
    %228 = tpu.matmul %226, %227, %cst_117 {dimension_numbers = #tpu.dot_dimension_numbers<[1], [0], [0], [1], [0, 0, 1, 1], [], []>} : vector<8x32xf32>, vector<32x128xf32>, vector<8x128xf32> -> vector<8x128xf32>
    %229 = arith.addf %225, %228 : vector<8x128xf32>
    %230 = vector.extract_strided_slice %229 {offsets = [0, 0], sizes = [8, 32], strides = [1, 1]} : vector<8x128xf32> to vector<8x32xf32>
    %231 = arith.negf %230 : vector<8x32xf32>
    %232 = math.exp %231 : vector<8x32xf32>
    %cst_118 = arith.constant 1.000000e+00 : f32
    %233 = vector.broadcast %cst_118 : f32 to vector<8x32xf32>
    %234 = arith.addf %233, %232 : vector<8x32xf32>
    %235 = arith.divf %233, %234 : vector<8x32xf32>
    %236 = vector.extract_strided_slice %229 {offsets = [0, 32], sizes = [8, 32], strides = [1, 1]} : vector<8x128xf32> to vector<8x32xf32>
    %237 = arith.negf %236 : vector<8x32xf32>
    %238 = math.exp %237 : vector<8x32xf32>
    %cst_119 = arith.constant 1.000000e+00 : f32
    %239 = vector.broadcast %cst_119 : f32 to vector<8x32xf32>
    %240 = arith.addf %239, %238 : vector<8x32xf32>
    %241 = arith.divf %239, %240 : vector<8x32xf32>
    %242 = vector.extract_strided_slice %229 {offsets = [0, 64], sizes = [8, 32], strides = [1, 1]} : vector<8x128xf32> to vector<8x32xf32>
    %243 = math.tanh %242 : vector<8x32xf32>
    %244 = vector.extract_strided_slice %229 {offsets = [0, 96], sizes = [8, 32], strides = [1, 1]} : vector<8x128xf32> to vector<8x32xf32>
    %245 = arith.negf %244 : vector<8x32xf32>
    %246 = math.exp %245 : vector<8x32xf32>
    %cst_120 = arith.constant 1.000000e+00 : f32
    %247 = vector.broadcast %cst_120 : f32 to vector<8x32xf32>
    %248 = arith.addf %247, %246 : vector<8x32xf32>
    %249 = arith.divf %247, %248 : vector<8x32xf32>
    %c0_121 = arith.constant 0 : index
    %c0_122 = arith.constant 0 : index
    %250 = vector.load %arg11[%c0_121, %c0_122] : memref<8x32xf32, #tpu.memory_space<vmem>>, vector<8x32xf32>
    %251 = arith.mulf %241, %250 : vector<8x32xf32>
    %252 = arith.mulf %235, %243 : vector<8x32xf32>
    %253 = arith.addf %251, %252 : vector<8x32xf32>
    %254 = math.tanh %253 : vector<8x32xf32>
    %255 = arith.mulf %249, %254 : vector<8x32xf32>
    %c0_123 = arith.constant 0 : index
    %c0_124 = arith.constant 0 : index
    %256 = vector.load %arg11[%c0_123, %c0_124] : memref<8x32xf32, #tpu.memory_space<vmem>>, vector<8x32xf32>
    tpu.vector_store %arg11[%c0_123, %c0_124], %253 {strides = array<i32>} : memref<8x32xf32, #tpu.memory_space<vmem>>, vector<8x32xf32>,
    %c0_125 = arith.constant 0 : index
    %c0_126 = arith.constant 0 : index
    %257 = vector.load %arg10[%c0_125, %c0_126] : memref<8x32xf32, #tpu.memory_space<vmem>>, vector<8x32xf32>
    tpu.vector_store %arg10[%c0_125, %c0_126], %255 {strides = array<i32>} : memref<8x32xf32, #tpu.memory_space<vmem>>, vector<8x32xf32>,
    %c7_i32 = arith.constant 7 : i32
    %258 = arith.index_cast %c7_i32 : i32 to index
    %c0_127 = arith.constant 0 : index
    %c0_128 = arith.constant 0 : index
    %259 = vector.load %arg9[%258, %c0_127, %c0_128] : memref<8x8x128xf32, #tpu.memory_space<vmem>>, vector<1x8x128xf32>
    %260 = vector.shape_cast %259 : vector<1x8x128xf32> to vector<8x128xf32>
    %c0_129 = arith.constant 0 : index
    %c0_130 = arith.constant 0 : index
    %261 = vector.load %arg10[%c0_129, %c0_130] : memref<8x32xf32, #tpu.memory_space<vmem>>, vector<8x32xf32>
    %c0_131 = arith.constant 0 : index
    %c0_132 = arith.constant 0 : index
    %262 = vector.load %arg2[%c0_131, %c0_132] : memref<32x128xf32, #tpu.memory_space<vmem>>, vector<32x128xf32>
    %cst_133 = arith.constant dense<0.000000e+00> : vector<8x128xf32>
    %263 = tpu.matmul %261, %262, %cst_133 {dimension_numbers = #tpu.dot_dimension_numbers<[1], [0], [0], [1], [0, 0, 1, 1], [], []>} : vector<8x32xf32>, vector<32x128xf32>, vector<8x128xf32> -> vector<8x128xf32>
    %264 = arith.addf %260, %263 : vector<8x128xf32>
    %265 = vector.extract_strided_slice %264 {offsets = [0, 0], sizes = [8, 32], strides = [1, 1]} : vector<8x128xf32> to vector<8x32xf32>
    %266 = arith.negf %265 : vector<8x32xf32>
    %267 = math.exp %266 : vector<8x32xf32>
    %cst_134 = arith.constant 1.000000e+00 : f32
    %268 = vector.broadcast %cst_134 : f32 to vector<8x32xf32>
    %269 = arith.addf %268, %267 : vector<8x32xf32>
    %270 = arith.divf %268, %269 : vector<8x32xf32>
    %271 = vector.extract_strided_slice %264 {offsets = [0, 32], sizes = [8, 32], strides = [1, 1]} : vector<8x128xf32> to vector<8x32xf32>
    %272 = arith.negf %271 : vector<8x32xf32>
    %273 = math.exp %272 : vector<8x32xf32>
    %cst_135 = arith.constant 1.000000e+00 : f32
    %274 = vector.broadcast %cst_135 : f32 to vector<8x32xf32>
    %275 = arith.addf %274, %273 : vector<8x32xf32>
    %276 = arith.divf %274, %275 : vector<8x32xf32>
    %277 = vector.extract_strided_slice %264 {offsets = [0, 64], sizes = [8, 32], strides = [1, 1]} : vector<8x128xf32> to vector<8x32xf32>
    %278 = math.tanh %277 : vector<8x32xf32>
    %279 = vector.extract_strided_slice %264 {offsets = [0, 96], sizes = [8, 32], strides = [1, 1]} : vector<8x128xf32> to vector<8x32xf32>
    %280 = arith.negf %279 : vector<8x32xf32>
    %281 = math.exp %280 : vector<8x32xf32>
    %cst_136 = arith.constant 1.000000e+00 : f32
    %282 = vector.broadcast %cst_136 : f32 to vector<8x32xf32>
    %283 = arith.addf %282, %281 : vector<8x32xf32>
    %284 = arith.divf %282, %283 : vector<8x32xf32>
    %c0_137 = arith.constant 0 : index
    %c0_138 = arith.constant 0 : index
    %285 = vector.load %arg11[%c0_137, %c0_138] : memref<8x32xf32, #tpu.memory_space<vmem>>, vector<8x32xf32>
    %286 = arith.mulf %276, %285 : vector<8x32xf32>
    %287 = arith.mulf %270, %278 : vector<8x32xf32>
    %288 = arith.addf %286, %287 : vector<8x32xf32>
    %289 = math.tanh %288 : vector<8x32xf32>
    %290 = arith.mulf %284, %289 : vector<8x32xf32>
    %c0_139 = arith.constant 0 : index
    %c0_140 = arith.constant 0 : index
    %291 = vector.load %arg11[%c0_139, %c0_140] : memref<8x32xf32, #tpu.memory_space<vmem>>, vector<8x32xf32>
    tpu.vector_store %arg11[%c0_139, %c0_140], %288 {strides = array<i32>} : memref<8x32xf32, #tpu.memory_space<vmem>>, vector<8x32xf32>,
    %c0_141 = arith.constant 0 : index
    %c0_142 = arith.constant 0 : index
    %292 = vector.load %arg10[%c0_141, %c0_142] : memref<8x32xf32, #tpu.memory_space<vmem>>, vector<8x32xf32>
    tpu.vector_store %arg10[%c0_141, %c0_142], %290 {strides = array<i32>} : memref<8x32xf32, #tpu.memory_space<vmem>>, vector<8x32xf32>,
    %c8_i32 = arith.constant 8 : i32
    %c0_143 = arith.constant 0 : index
    %c0_144 = arith.constant 0 : index
    %293 = vector.load %arg10[%c0_143, %c0_144] : memref<8x32xf32, #tpu.memory_space<vmem>>, vector<8x32xf32>
    %c0_145 = arith.constant 0 : index
    %c0_146 = arith.constant 0 : index
    %294 = vector.load %arg4[%c0_145, %c0_146] : memref<32x16xf32, #tpu.memory_space<vmem>>, vector<32x16xf32>
    %cst_147 = arith.constant dense<0.000000e+00> : vector<8x16xf32>
    %295 = tpu.matmul %293, %294, %cst_147 {dimension_numbers = #tpu.dot_dimension_numbers<[1], [0], [0], [1], [0, 0, 1, 1], [], []>} : vector<8x32xf32>, vector<32x16xf32>, vector<8x16xf32> -> vector<8x16xf32>
    %c0_148 = arith.constant 0 : index
    %c0_149 = arith.constant 0 : index
    %296 = vector.load %arg5[%c0_148, %c0_149] : memref<1x16xf32, #tpu.memory_space<vmem>>, vector<1x16xf32>
    %297 = vector.broadcast %296 : vector<1x16xf32> to vector<8x16xf32>
    %298 = arith.addf %295, %297 : vector<8x16xf32>
    %cst_150 = arith.constant 0.000000e+00 : f32
    %299 = vector.broadcast %cst_150 : f32 to vector<8x16xf32>
    %300 = arith.maximumf %298, %299 : vector<8x16xf32>
    %c0_151 = arith.constant 0 : index
    %c0_152 = arith.constant 0 : index
    %301 = vector.load %arg6[%c0_151, %c0_152] : memref<16x1xf32, #tpu.memory_space<vmem>>, vector<16x1xf32>
    %cst_153 = arith.constant dense<0.000000e+00> : vector<8x1xf32>
    %302 = tpu.matmul %300, %301, %cst_153 {dimension_numbers = #tpu.dot_dimension_numbers<[1], [0], [0], [1], [0, 0, 1, 1], [], []>} : vector<8x16xf32>, vector<16x1xf32>, vector<8x1xf32> -> vector<8x1xf32>
    %c0_154 = arith.constant 0 : index
    %c0_155 = arith.constant 0 : index
    %303 = vector.load %arg7[%c0_154, %c0_155] : memref<1x1xf32, #tpu.memory_space<vmem>>, vector<1x1xf32>
    %304 = vector.broadcast %303 : vector<1x1xf32> to vector<8x1xf32>
    %305 = arith.addf %302, %304 : vector<8x1xf32>
    %c0_156 = arith.constant 0 : index
    %c0_157 = arith.constant 0 : index
    %306 = vector.load %arg8[%c0_156, %c0_157] : memref<8x1xf32, #tpu.memory_space<vmem>>, vector<8x1xf32>
    tpu.vector_store %arg8[%c0_156, %c0_157], %305 {strides = array<i32>} : memref<8x1xf32, #tpu.memory_space<vmem>>, vector<8x1xf32>,
    return
  }
}

</mosaic_0001>

<bundles_post_ra>
// kernel: tpu_custom_call.1
= control target key start
LH: loop header
LB: loop body
LE: loop exit
PB: predicated region body
PF: predicated region fallthrough
CT: control target
= control target key end

     0   :  { %s1992_s0 = inlined_call_operand.vmem [shape: f32[8,8,8], index: 0, kind: input, shape index: {}]   ;;  %s1993_s1 = inlined_call_operand.hbm [shape: f32[8,128], index: 1, kind: input, shape index: {}]   ;;  %s1994_s2 = inlined_call_operand.hbm [shape: f32[32,128], index: 2, kind: input, shape index: {}]   ;;  %s1995_s3 = inlined_call_operand.vmem [shape: f32[1,128], index: 3, kind: input, shape index: {}]   ;;  %s1996_s4 = inlined_call_operand.vmem [shape: f32[32,16], index: 4, kind: input, shape index: {}]   ;;  %s1997_s5 = inlined_call_operand.vmem [shape: f32[1,16], index: 5, kind: input, shape index: {}]   ;;  %s1998_s6 = inlined_call_operand.vmem [shape: f32[16,1], index: 6, kind: input, shape index: {}]   ;;  %s1999_s7 = inlined_call_operand.<no memory space> [shape: f32[1,1], index: 7, kind: input, shape index: {}]   ;;  %s2000_s8 = inlined_call_operand.vmem [shape: f32[8,1], index: 8, kind: output, shape index: {}]  }
   0x1   :  { %v13_v0 = vstv %s1999_s7 }
   0x2   :  { %14 = vst [vmem:[#allocation5] sm:$0x1] %v13_v0 }
   0x3   :  { %15 = vsyncpa [#allocation7], 0 }
   0x4   :  { %16 = vsyncpa [#allocation9], 0  ;;  %s1673_s29 = smov [#allocation6]   ;;  %s1674_s9 = smov [#allocation8]  }
   0x5   :  { %s25_s30 = sshll.u32 %s1673_s29, 4  ;;  %s34_s10 = sshll.u32 %s1674_s9, 4  ;;  %s26_s30 = int_to_ptr.vmem [resolvable:$true] %s25_s30  ;;  %s35_s10 = int_to_ptr.vmem [resolvable:$true] %s34_s10 }
   0x6   :  { %s1637_s11 = scalar_lea.vmem %s26_s30, 128  ;;  %p1642_p1 = scmp.lt.s32.totalorder %s26_s30, %s26_s30 }
   0x7   :  { %p1638_p0 = scmp.ne.s32.totalorder %s26_s30, %s1637_s11  ;;  %p1643_p2 = scmp.lt.s32.totalorder %s1637_s11, %s1637_s11 }
   0x9   :  { %p1644_p3 = por %p1643_p2, %p1642_p1 }
   0xb   :  { %p1645_p4 = pnand %p1644_p3, %p1638_p0 }
   0xd   :  { %1648 = shalt.err (!%p1645_p4)
}
   0xe   :  { %28 = dma.hbm_to_vmem [thread:$0]  %s1993_s1, 128, %s26_s30, [#allocation7]  }
   0xf   :  { %s1657_s7 = scalar_lea.vmem %s35_s10, 512  ;;  %p1662_p6 = scmp.lt.s32.totalorder %s35_s10, %s35_s10 }
  0x10   :  { %p1658_p5 = scmp.ne.s32.totalorder %s35_s10, %s1657_s7  ;;  %p1663_p7 = scmp.lt.s32.totalorder %s1657_s7, %s1657_s7 }
  0x12   :  { %p1664_p8 = por %p1663_p7, %p1662_p6 }
  0x14   :  { %p1665_p9 = pnand %p1664_p8, %p1658_p5 }
  0x16   :  { %1668 = shalt.err (!%p1665_p9)
}
  0x17   :  { %s1675_s14 = smov 128   ;;  %s1676_s15 = smov 8  }
  0x18   :  { %40 = dma.hbm_to_vmem [thread:$0]  %s1994_s2, 512, %s35_s10, [#allocation9], %s1675_s14, %s1675_s14, %s1676_s15  }
  0x19   :  { %1669 = dma.done.wait [#allocation7], 128  }
  0x1a   :  { %1670 = vsyncadd [#allocation7], 4294967168 }
  0x1b   :  { %1671 = dma.done.wait [#allocation9], 512  }
  0x1c   :  { %1672 = vsyncadd [#allocation9], 4294966784  ;;  %vm211_vm0 = vcmask 261120   ;;  %v1677_v1 = vmov 0.0   ;;  %vm1678_vm1 = vmmov 0   ;;  %vm73_vm2 = vcmask 64512  }
  0x1d   :  { %1450 = vmatprep.subr.mxu1 %v1677_v1  ;;  %1458 = vmatprep.mubr.msk.f32.mxu1 %vm1678_vm1, %v1677_v1  ;;  %212 = vst.msk [vmem:[#allocation3] sm:$0xff] %vm211_vm0, %v1677_v1  ;;  %213 = vst.msk [vmem:[#allocation4] sm:$0xff] %vm211_vm0, %v1677_v1  ;;  %v65_v2 = vld [vmem:[#allocation6] sm:$0xff]  ;;  %v57_v4 = vld [vmem:[%s1992_s0] sm:$0xff]  ;;  %s1679_s22 = smov 64   ;;  %s1680_s23 = smov 32  }
  0x1e   :  { %v1743_v3 = vld [vmem:[#allocation8 + $0x18] sm:$0xff]  ;;  %1436 = vmatprep.subr.mxu0 %v65_v2  ;;  %v58_v5 = vld [vmem:[%s1992_s0 + $0x8] sm:$0xff]  ;;  %1438 = vmatprep.mubr.msk.f32.mxu0 %vm73_vm2, %v57_v4  ;;  %v1762_v8 = vld [vmem:[#allocation8] sm:$0xff]  ;;  %vm1268_vm3 = vcmask 130048   ;;  %vm1342_vm4 = vcmask 7168  }
  0x1f   :  { %1451 = vmatpush3.msra.mxu1 %v1743_v3  ;;  %v1752_v6 = vld [vmem:[#allocation8 + $0x10] sm:$0xff]  ;;  %1437 = vmatpush3.msra.mxu0 %v65_v2  ;;  %v1757_v7 = vld [vmem:[#allocation8 + $0x8] sm:$0xff]  ;;  %v1790_v11 = vld [vmem:[%s1995_s3] ss:$0 sm:$0xff]  ;;  %s1681_s3 = smov 96  }
  0x20   :  { %1452 = vmatprep.subr.mxu1 %v1677_v1  ;;  %1439 = vmatmul.mubr.msk.f32.vlgmr.msra.gmra.mxu0 %vm73_vm2, %v58_v5  ;;  %v59_v52 = vld [vmem:[%s1992_s0 + $0x10] sm:$0xff]  ;;  %v60_v53 = vld [vmem:[%s1992_s0 + $0x18] sm:$0xff]  ;;  %v61_v54 = vld [vmem:[%s1992_s0 + $0x20] sm:$0xff] }
  0x21   :  { %1453 = vmatpush3.msra.mxu1 %v1752_v6  ;;  %1472 = vmatprep.subr.mxu0 %v1677_v1  ;;  %v62_v55 = vld [vmem:[%s1992_s0 + $0x28] sm:$0xff]  ;;  %v63_v56 = vld [vmem:[%s1992_s0 + $0x30] sm:$0xff]  ;;  %v64_v57 = vld [vmem:[%s1992_s0 + $0x38] sm:$0xff] }
  0x22   :  { %1454 = vmatprep.subr.mxu1 %v1677_v1  ;;  %1473 = vmatpush3.msra.mxu0 %v1743_v3 }
  0x23   :  { %1455 = vmatpush3.msra.mxu1 %v1757_v7  ;;  %1474 = vmatprep.subr.mxu0 %v1677_v1 }
  0x24   :  { %v215_v9 = vld [vmem:[#allocation3] sm:$0xff]  ;;  %1456 = vmatprep.subr.mxu1 %v1677_v1  ;;  %1475 = vmatpush3.msra.mxu0 %v1752_v6  ;;  %v301_v18 = vld [vmem:[#allocation4] sm:$0xff] }
  0x25   :  { %1457 = vmatpush3.msra.mxu1 %v1762_v8  ;;  %1476 = vmatprep.subr.mxu0 %v1677_v1 }
  0x26   :  { %1459 = vmatmul.mubr.msk.f32.vlgmr.msra.gmra.mxu1 %vm211_vm0, %v215_v9  ;;  %1461 = vmatprep.subr.mxu1 %v1677_v1 }
  0x27   :  { %1462 = vmatpush3.msra.mxu1 %v1743_v3  ;;  %1469 = vmatprep.mubr.msk.f32.mxu1 %vm1678_vm1, %v1677_v1 }
  0x28   :  { %1463 = vmatprep.subr.mxu1 %v1677_v1  ;;  %1477 = vmatpush3.msra.mxu0 %v1757_v7 }
  0x29   :  { %1464 = vmatpush3.msra.mxu1 %v1752_v6  ;;  %1478 = vmatprep.subr.mxu0 %v1677_v1 }
  0x2a   :  { %1465 = vmatprep.subr.mxu1 %v1677_v1  ;;  %1479 = vmatpush3.msra.mxu0 %v1762_v8 }
  0x2b   :  { %1466 = vmatpush3.msra.mxu1 %v1757_v7  ;;  %1494 = vmatprep.subr.mxu0 %v1677_v1 }
  0x2c   :  { %1467 = vmatprep.subr.mxu1 %v1677_v1  ;;  %1441 = vmatprep.mubr.msk.f32.mxu0 %vm73_vm2, %v59_v52 }
  0x2d   :  { %1468 = vmatpush3.msra.mxu1 %v1762_v8  ;;  %1442 = vmatmul.mubr.msk.f32.gmra.mxu0 %vm73_vm2, %v60_v53 }
  0x2e   :  { %1483 = vmatprep.subr.mxu1 %v1677_v1  ;;  %1444 = vmatprep.mubr.msk.f32.mxu0 %vm73_vm2, %v61_v54 }
  0x31   :  { %1445 = vmatmul.mubr.msk.f32.gmra.mxu0 %vm73_vm2, %v62_v55 }
  0x32   :  { %1447 = vmatprep.mubr.msk.f32.mxu0 %vm73_vm2, %v63_v56 }
  0x35   :  { %1448 = vmatmul.mubr.msk.f32.gmra.mxu0 %vm73_vm2, %v64_v57 }
  0x36   :  { %1480 = vmatprep.mubr.msk.f32.mxu0 %vm1678_vm1, %v1677_v1 }
  0xe0   :  { %v1440_v10 = vpop.f32.mrf.mxu0 }
  0xe1   :  { %v170_v36 = vadd.f32 %v1440_v10, %v1790_v11 }
  0xe2   :  { %v164_v12 = vpop.f32.mrf.mxu0 }
  0xe3   :  { %v165_v13 = vadd.f32 %v1790_v11, %v164_v12 }
  0xe6   :  { %v289_v14 = vpop.f32.mrf.mxu1 }
  0xe7   :  { %v293_v15 = vadd.f32 %v289_v14, %v165_v13 }
  0xe8   :  { %v1460_v16 = vpop.f32.mrf.mxu1 }
  0xe9   :  { %1565 = vtanh.f32 %v293_v15  ;;  %v1360_v19 = vmul.f32 -1.442695, %v293_v15 }
  0xeb   :  { %1567 = vpow2.f32 %v1360_v19 }
  0xed   :  { %v1443_v0 = vpop.f32.mrf.mxu0 }
  0xef   :  { %v174_v2 = vpop.f32.mrf.mxu0 }
  0xf0   :  { %v175_v12 = vadd.f32 %v1790_v11, %v174_v2 }
  0xf1   :  { %v1859_v4 = vpop.f32.mrf.mxu0 }
  0xf3   :  { %v1861_v5 = vpop.f32.mrf.mxu0 }
  0xf4   :  { %v185_v56 = vadd.f32 %v1790_v11, %v1861_v5 }
  0xf5   :  { %v1863_v9 = vpop.f32.mrf.mxu0 }
  0xf6   :  { %v1566_v17 = vpop.eup %1565 }
  0xf7   :  { %308 = vrot.lane.b32.xlu0 %v1566_v17, %s1679_s22  ;;  %v1865_v10 = vpop.f32.mrf.mxu0 }
  0xf8   :  { %v1568_v20 = vpop.eup %1567 }
  0xf9   :  { %v297_v21 = vadd.f32 1.0, %v1568_v20 }
  0xfb   :  { %303 = vrot.lane.b32.xlu0 %v301_v18, %s1680_s23  ;;  %1569 = vrcp.f32 %v297_v21 }
 0x108   :  { %v1570_v22 = vpop.eup %1569 }
 0x169   :  { %v309_v23 = vpop.permute.xlu0 %308 }
 0x16a   :  { %v311_v24 = vmul.f32 %v1570_v22, %v309_v23 }
 0x16c   :  { %313 = vrot.lane.b32.xlu1 %v311_v24, %s1680_s23 }
 0x16d   :  { %v304_v25 = vpop.permute.xlu0 %303 }
 0x16e   :  { %v306_v26 = vmul.f32 %v1570_v22, %v304_v25 }
 0x1de   :  { %v314_v27 = vpop.permute.xlu1 %313 }
 0x1df   :  { %v316_v28 = vadd.f32 %v314_v27, %v306_v26 }
 0x1e1   :  { %1571 = vtanh.f32 %v316_v28 }
 0x1ee   :  { %v1572_v29 = vpop.eup %1571 }
 0x1ef   :  { %319 = vrot.lane.b32.xlu1 %v1572_v29, %s1679_s22 }
 0x1f3   :  { %324 = vrot.lane.b32.xlu1 %v316_v28, %s1681_s3 }
 0x261   :  { %v320_v30 = vpop.permute.xlu1 %319 }
 0x262   :  { %v322_v31 = vmul.f32 %v1570_v22, %v320_v30 }
 0x264   :  { %329 = vrot.lane.b32.xlu0 %v322_v31, %s1680_s23 }
 0x265   :  { %v325_v32 = vpop.permute.xlu1 %324 }
 0x266   :  { %327 = vst.msk [vmem:[#allocation4] sm:$0xff] %vm211_vm0, %v325_v32 }
 0x26d   :  { %v421_v33 = vld [vmem:[#allocation4] sm:$0xff] }
 0x26e   :  { %423 = vrot.lane.b32.xlu1 %v421_v33, %s1680_s23 }
 0x2d6   :  { %v330_v34 = vpop.permute.xlu0 %329 }
 0x2d7   :  { %332 = vst.msk [vmem:[#allocation3] sm:$0xff] %vm211_vm0, %v330_v34  ;;  %v180_v34 = vadd.f32 %v1443_v0, %v1790_v11 }
 0x2de   :  { %v335_v35 = vld [vmem:[#allocation3] sm:$0xff] }
 0x2df   :  { %1470 = vmatmul.mubr.msk.f32.vlgmr.msra.gmra.mxu1 %vm211_vm0, %v335_v35 }
 0x2e0   :  { %1484 = vmatpush3.msra.mxu1 %v1743_v3  ;;  %1491 = vmatprep.mubr.msk.f32.mxu1 %vm1678_vm1, %v1677_v1  ;;  %v424_v47 = vpop.permute.xlu1 %423 }
 0x2e1   :  { %1485 = vmatprep.subr.mxu1 %v1677_v1 }
 0x2e2   :  { %1486 = vmatpush3.msra.mxu1 %v1752_v6 }
 0x2e3   :  { %1487 = vmatprep.subr.mxu1 %v1677_v1 }
 0x2e4   :  { %1488 = vmatpush3.msra.mxu1 %v1757_v7 }
 0x2e5   :  { %1489 = vmatprep.subr.mxu1 %v1677_v1 }
 0x2e6   :  { %1490 = vmatpush3.msra.mxu1 %v1762_v8 }
 0x2e7   :  { %1505 = vmatprep.subr.mxu1 %v1677_v1 }
 0x39f   :  { %v409_v37 = vpop.f32.mrf.mxu1 }
 0x3a0   :  { %v413_v38 = vadd.f32 %v409_v37, %v170_v36 }
 0x3a1   :  { %v1471_v39 = vpop.f32.mrf.mxu1 }
 0x3a2   :  { %1573 = vtanh.f32 %v413_v38  ;;  %v1362_v41 = vmul.f32 -1.442695, %v413_v38 }
 0x3a4   :  { %1575 = vpow2.f32 %v1362_v41 }
 0x3af   :  { %v1574_v40 = vpop.eup %1573 }
 0x3b0   :  { %428 = vrot.lane.b32.xlu0 %v1574_v40, %s1679_s22 }
 0x3b1   :  { %v1576_v42 = vpop.eup %1575 }
 0x3b2   :  { %v417_v43 = vadd.f32 1.0, %v1576_v42 }
 0x3b4   :  { %1577 = vrcp.f32 %v417_v43 }
 0x3c1   :  { %v1578_v44 = vpop.eup %1577 }
 0x3c2   :  { %v426_v48 = vmul.f32 %v1578_v44, %v424_v47 }
 0x422   :  { %v429_v45 = vpop.permute.xlu0 %428 }
 0x423   :  { %v431_v46 = vmul.f32 %v1578_v44, %v429_v45 }
 0x425   :  { %433 = vrot.lane.b32.xlu0 %v431_v46, %s1680_s23 }
 0x497   :  { %v434_v49 = vpop.permute.xlu0 %433 }
 0x498   :  { %v436_v50 = vadd.f32 %v434_v49, %v426_v48 }
 0x49a   :  { %1579 = vtanh.f32 %v436_v50 }
 0x4a7   :  { %v1580_v51 = vpop.eup %1579 }
 0x4a8   :  { %439 = vrot.lane.b32.xlu1 %v1580_v51, %s1679_s22 }
 0x4ac   :  { %444 = vrot.lane.b32.xlu1 %v436_v50, %s1681_s3 }
 0x51a   :  { %v440_v58 = vpop.permute.xlu1 %439 }
 0x51b   :  { %v442_v59 = vmul.f32 %v1578_v44, %v440_v58 }
 0x51d   :  { %449 = vrot.lane.b32.xlu0 %v442_v59, %s1680_s23 }
 0x51e   :  { %v445_v60 = vpop.permute.xlu1 %444 }
 0x51f   :  { %447 = vst.msk [vmem:[#allocation4] sm:$0xff] %vm211_vm0, %v445_v60 }
 0x526   :  { %v541_v61 = vld [vmem:[#allocation4] sm:$0xff] }
 0x527   :  { %543 = vrot.lane.b32.xlu1 %v541_v61, %s1680_s23 }
 0x58f   :  { %v450_v62 = vpop.permute.xlu0 %449 }
 0x590   :  { %452 = vst.msk [vmem:[#allocation3] sm:$0xff] %vm211_vm0, %v450_v62 }
 0x597   :  { %v455_v63 = vld [vmem:[#allocation3] sm:$0xff] }
 0x598   :  { %1481 = vmatmul.mubr.msk.f32.vlgmr.msra.gmra.mxu0 %vm211_vm0, %v455_v63 }
 0x599   :  { %1495 = vmatpush3.msra.mxu0 %v1743_v3  ;;  %1502 = vmatprep.mubr.msk.f32.mxu0 %vm1678_vm1, %v1677_v1  ;;  %v544_v23 = vpop.permute.xlu1 %543 }
 0x59a   :  { %1496 = vmatprep.subr.mxu0 %v1677_v1 }
 0x59b   :  { %1497 = vmatpush3.msra.mxu0 %v1752_v6 }
 0x59c   :  { %1498 = vmatprep.subr.mxu0 %v1677_v1 }
 0x59d   :  { %1499 = vmatpush3.msra.mxu0 %v1757_v7 }
 0x59e   :  { %1500 = vmatprep.subr.mxu0 %v1677_v1 }
 0x59f   :  { %1501 = vmatpush3.msra.mxu0 %v1762_v8 }
 0x5a0   :  { %1516 = vmatprep.subr.mxu0 %v1677_v1 }
 0x658   :  { %v529_v13 = vpop.f32.mrf.mxu0 }
 0x659   :  { %v533_v14 = vadd.f32 %v529_v13, %v175_v12 }
 0x65a   :  { %v1482_v15 = vpop.f32.mrf.mxu0 }
 0x65b   :  { %1581 = vtanh.f32 %v533_v14  ;;  %v1364_v17 = vmul.f32 -1.442695, %v533_v14 }
 0x65d   :  { %1583 = vpow2.f32 %v1364_v17 }
 0x668   :  { %v1582_v16 = vpop.eup %1581 }
 0x669   :  { %548 = vrot.lane.b32.xlu0 %v1582_v16, %s1679_s22 }
 0x66a   :  { %v1584_v18 = vpop.eup %1583 }
 0x66b   :  { %v537_v19 = vadd.f32 1.0, %v1584_v18 }
 0x66d   :  { %1585 = vrcp.f32 %v537_v19 }
 0x67a   :  { %v1586_v20 = vpop.eup %1585 }
 0x67b   :  { %v546_v24 = vmul.f32 %v1586_v20, %v544_v23 }
 0x6db   :  { %v549_v21 = vpop.permute.xlu0 %548 }
 0x6dc   :  { %v551_v22 = vmul.f32 %v1586_v20, %v549_v21 }
 0x6de   :  { %553 = vrot.lane.b32.xlu0 %v551_v22, %s1680_s23 }
 0x750   :  { %v554_v25 = vpop.permute.xlu0 %553 }
 0x751   :  { %v556_v26 = vadd.f32 %v554_v25, %v546_v24 }
 0x753   :  { %1587 = vtanh.f32 %v556_v26 }
 0x760   :  { %v1588_v27 = vpop.eup %1587 }
 0x761   :  { %559 = vrot.lane.b32.xlu1 %v1588_v27, %s1679_s22 }
 0x765   :  { %564 = vrot.lane.b32.xlu1 %v556_v26, %s1681_s3 }
 0x7d3   :  { %v560_v28 = vpop.permute.xlu1 %559 }
 0x7d4   :  { %v562_v29 = vmul.f32 %v1586_v20, %v560_v28 }
 0x7d6   :  { %569 = vrot.lane.b32.xlu0 %v562_v29, %s1680_s23 }
 0x7d7   :  { %v565_v30 = vpop.permute.xlu1 %564 }
 0x7d8   :  { %567 = vst.msk [vmem:[#allocation4] sm:$0xff] %vm211_vm0, %v565_v30 }
 0x7df   :  { %v661_v31 = vld [vmem:[#allocation4] sm:$0xff] }
 0x7e0   :  { %663 = vrot.lane.b32.xlu1 %v661_v31, %s1680_s23 }
 0x848   :  { %v570_v32 = vpop.permute.xlu0 %569 }
 0x849   :  { %572 = vst.msk [vmem:[#allocation3] sm:$0xff] %vm211_vm0, %v570_v32 }
 0x850   :  { %v575_v33 = vld [vmem:[#allocation3] sm:$0xff] }
 0x851   :  { %1492 = vmatmul.mubr.msk.f32.vlgmr.msra.gmra.mxu1 %vm211_vm0, %v575_v33 }
 0x852   :  { %1506 = vmatpush3.msra.mxu1 %v1743_v3  ;;  %1513 = vmatprep.mubr.msk.f32.mxu1 %vm1678_vm1, %v1677_v1  ;;  %v664_v45 = vpop.permute.xlu1 %663 }
 0x853   :  { %1507 = vmatprep.subr.mxu1 %v1677_v1 }
 0x854   :  { %1508 = vmatpush3.msra.mxu1 %v1752_v6 }
 0x855   :  { %1509 = vmatprep.subr.mxu1 %v1677_v1 }
 0x856   :  { %1510 = vmatpush3.msra.mxu1 %v1757_v7 }
 0x857   :  { %1511 = vmatprep.subr.mxu1 %v1677_v1 }
 0x858   :  { %1512 = vmatpush3.msra.mxu1 %v1762_v8 }
 0x859   :  { %1527 = vmatprep.subr.mxu1 %v1677_v1 }
 0x911   :  { %v649_v35 = vpop.f32.mrf.mxu1 }
 0x912   :  { %v653_v36 = vadd.f32 %v649_v35, %v180_v34 }
 0x913   :  { %v1493_v37 = vpop.f32.mrf.mxu1 }
 0x914   :  { %1589 = vtanh.f32 %v653_v36  ;;  %v1366_v39 = vmul.f32 -1.442695, %v653_v36 }
 0x916   :  { %1591 = vpow2.f32 %v1366_v39 }
 0x921   :  { %v1590_v38 = vpop.eup %1589 }
 0x922   :  { %668 = vrot.lane.b32.xlu0 %v1590_v38, %s1679_s22 }
 0x923   :  { %v1592_v40 = vpop.eup %1591 }
 0x924   :  { %v657_v41 = vadd.f32 1.0, %v1592_v40  ;;  %v195_v40 = vadd.f32 %v1790_v11, %v1865_v10 }
 0x926   :  { %1593 = vrcp.f32 %v657_v41 }
 0x933   :  { %v1594_v42 = vpop.eup %1593 }
 0x934   :  { %v666_v46 = vmul.f32 %v1594_v42, %v664_v45 }
 0x994   :  { %v669_v43 = vpop.permute.xlu0 %668 }
 0x995   :  { %v671_v44 = vmul.f32 %v1594_v42, %v669_v43 }
 0x997   :  { %673 = vrot.lane.b32.xlu0 %v671_v44, %s1680_s23 }
 0xa09   :  { %v674_v47 = vpop.permute.xlu0 %673 }
 0xa0a   :  { %v676_v48 = vadd.f32 %v674_v47, %v666_v46 }
 0xa0c   :  { %1595 = vtanh.f32 %v676_v48 }
 0xa19   :  { %v1596_v49 = vpop.eup %1595 }
 0xa1a   :  { %679 = vrot.lane.b32.xlu1 %v1596_v49, %s1679_s22 }
 0xa1e   :  { %684 = vrot.lane.b32.xlu1 %v676_v48, %s1681_s3 }
 0xa8c   :  { %v680_v50 = vpop.permute.xlu1 %679 }
 0xa8d   :  { %v682_v51 = vmul.f32 %v1594_v42, %v680_v50 }
 0xa8f   :  { %689 = vrot.lane.b32.xlu0 %v682_v51, %s1680_s23 }
 0xa90   :  { %v685_v52 = vpop.permute.xlu1 %684 }
 0xa91   :  { %687 = vst.msk [vmem:[#allocation4] sm:$0xff] %vm211_vm0, %v685_v52 }
 0xa98   :  { %v781_v53 = vld [vmem:[#allocation4] sm:$0xff] }
 0xa99   :  { %783 = vrot.lane.b32.xlu1 %v781_v53, %s1680_s23 }
 0xb01   :  { %v690_v54 = vpop.permute.xlu0 %689 }
 0xb02   :  { %692 = vst.msk [vmem:[#allocation3] sm:$0xff] %vm211_vm0, %v690_v54 }
 0xb09   :  { %v695_v55 = vld [vmem:[#allocation3] sm:$0xff] }
 0xb0a   :  { %1503 = vmatmul.mubr.msk.f32.vlgmr.msra.gmra.mxu0 %vm211_vm0, %v695_v55 }
 0xb0b   :  { %1517 = vmatpush3.msra.mxu0 %v1743_v3  ;;  %1524 = vmatprep.mubr.msk.f32.mxu0 %vm1678_vm1, %v1677_v1  ;;  %v784_v13 = vpop.permute.xlu1 %783 }
 0xb0c   :  { %1518 = vmatprep.subr.mxu0 %v1677_v1 }
 0xb0d   :  { %1519 = vmatpush3.msra.mxu0 %v1752_v6 }
 0xb0e   :  { %1520 = vmatprep.subr.mxu0 %v1677_v1 }
 0xb0f   :  { %1521 = vmatpush3.msra.mxu0 %v1757_v7 }
 0xb10   :  { %1522 = vmatprep.subr.mxu0 %v1677_v1 }
 0xb11   :  { %1523 = vmatpush3.msra.mxu0 %v1762_v8 }
 0xb12   :  { %1538 = vmatprep.subr.mxu0 %v1677_v1 }
 0xbca   :  { %v769_v57 = vpop.f32.mrf.mxu0 }
 0xbcb   :  { %v773_v58 = vadd.f32 %v769_v57, %v185_v56 }
 0xbcc   :  { %v1504_v59 = vpop.f32.mrf.mxu0 }
 0xbcd   :  { %1597 = vtanh.f32 %v773_v58  ;;  %v1368_v61 = vmul.f32 -1.442695, %v773_v58 }
 0xbcf   :  { %1599 = vpow2.f32 %v1368_v61  ;;  %v200_v61 = vadd.f32 %v1863_v9, %v1790_v11 }
 0xbda   :  { %v1598_v60 = vpop.eup %1597 }
 0xbdb   :  { %788 = vrot.lane.b32.xlu0 %v1598_v60, %s1679_s22 }
 0xbdc   :  { %v1600_v62 = vpop.eup %1599 }
 0xbdd   :  { %v777_v63 = vadd.f32 1.0, %v1600_v62 }
 0xbdf   :  { %1601 = vrcp.f32 %v777_v63 }
 0xbec   :  { %v1602_v0 = vpop.eup %1601 }
 0xbed   :  { %v786_v14 = vmul.f32 %v1602_v0, %v784_v13 }
 0xc4d   :  { %v789_v2 = vpop.permute.xlu0 %788 }
 0xc4e   :  { %v791_v12 = vmul.f32 %v1602_v0, %v789_v2 }
 0xc50   :  { %793 = vrot.lane.b32.xlu0 %v791_v12, %s1680_s23 }
 0xcc2   :  { %v794_v5 = vpop.permute.xlu0 %793 }
 0xcc3   :  { %v796_v15 = vadd.f32 %v794_v5, %v786_v14 }
 0xcc5   :  { %1603 = vtanh.f32 %v796_v15 }
 0xcd2   :  { %v1604_v16 = vpop.eup %1603 }
 0xcd3   :  { %799 = vrot.lane.b32.xlu1 %v1604_v16, %s1679_s22 }
 0xcd7   :  { %804 = vrot.lane.b32.xlu1 %v796_v15, %s1681_s3 }
 0xd45   :  { %v800_v17 = vpop.permute.xlu1 %799 }
 0xd46   :  { %v802_v18 = vmul.f32 %v1602_v0, %v800_v17 }
 0xd48   :  { %809 = vrot.lane.b32.xlu0 %v802_v18, %s1680_s23 }
 0xd49   :  { %v805_v19 = vpop.permute.xlu1 %804 }
 0xd4a   :  { %807 = vst.msk [vmem:[#allocation4] sm:$0xff] %vm211_vm0, %v805_v19 }
 0xd51   :  { %v901_v20 = vld [vmem:[#allocation4] sm:$0xff] }
 0xd52   :  { %903 = vrot.lane.b32.xlu1 %v901_v20, %s1680_s23  ;;  %v1177_v20 = vld [vmem:[%s1996_s4 + $0x18] sm:$0xff] }
 0xdba   :  { %v810_v21 = vpop.permute.xlu0 %809 }
 0xdbb   :  { %812 = vst.msk [vmem:[#allocation3] sm:$0xff] %vm211_vm0, %v810_v21  ;;  %v1176_v21 = vld [vmem:[%s1996_s4 + $0x10] sm:$0xff] }
 0xdc2   :  { %v815_v22 = vld [vmem:[#allocation3] sm:$0xff] }
 0xdc3   :  { %1514 = vmatmul.mubr.msk.f32.vlgmr.msra.gmra.mxu1 %vm211_vm0, %v815_v22  ;;  %v1175_v22 = vld [vmem:[%s1996_s4 + $0x8] sm:$0xff] }
 0xdc4   :  { %1528 = vmatpush3.msra.mxu1 %v1743_v3  ;;  %1535 = vmatprep.mubr.msk.f32.mxu1 %vm1678_vm1, %v1677_v1  ;;  %v190_v3 = vadd.f32 %v1859_v4, %v1790_v11  ;;  %v904_v30 = vpop.permute.xlu1 %903 }
 0xdc5   :  { %1529 = vmatprep.subr.mxu1 %v1677_v1 }
 0xdc6   :  { %1530 = vmatpush3.msra.mxu1 %v1752_v6 }
 0xdc7   :  { %1531 = vmatprep.subr.mxu1 %v1677_v1 }
 0xdc8   :  { %1532 = vmatpush3.msra.mxu1 %v1757_v7 }
 0xdc9   :  { %1533 = vmatprep.subr.mxu1 %v1677_v1 }
 0xdca   :  { %1534 = vmatpush3.msra.mxu1 %v1762_v8 }
 0xdcb   :  { %1549 = vmatprep.subr.mxu1 %v1677_v1 }
 0xe83   :  { %v889_v23 = vpop.f32.mrf.mxu1 }
 0xe84   :  { %v893_v24 = vadd.f32 %v889_v23, %v190_v3  ;;  %v1174_v3 = vld [vmem:[%s1996_s4] sm:$0xff] }
 0xe85   :  { %v1515_v25 = vpop.f32.mrf.mxu1 }
 0xe86   :  { %1605 = vtanh.f32 %v893_v24  ;;  %v1370_v6 = vmul.f32 -1.442695, %v893_v24 }
 0xe88   :  { %1607 = vpow2.f32 %v1370_v6 }
 0xe93   :  { %v1606_v26 = vpop.eup %1605 }
 0xe94   :  { %908 = vrot.lane.b32.xlu0 %v1606_v26, %s1679_s22 }
 0xe95   :  { %v1608_v27 = vpop.eup %1607 }
 0xe96   :  { %v897_v7 = vadd.f32 1.0, %v1608_v27  ;;  %v1260_v27 = vld [vmem:[%s1998_s6 + $0x8] sm:$0xff] }
 0xe98   :  { %1609 = vrcp.f32 %v897_v7  ;;  %v1259_v7 = vld [vmem:[%s1998_s6] sm:$0xff] }
 0xea5   :  { %v1610_v28 = vpop.eup %1609 }
 0xea6   :  { %v906_v31 = vmul.f32 %v1610_v28, %v904_v30 }
 0xf06   :  { %v909_v29 = vpop.permute.xlu0 %908 }
 0xf07   :  { %v911_v8 = vmul.f32 %v1610_v28, %v909_v29 }
 0xf09   :  { %913 = vrot.lane.b32.xlu0 %v911_v8, %s1680_s23 }
 0xf7b   :  { %v914_v4 = vpop.permute.xlu0 %913 }
 0xf7c   :  { %v916_v32 = vadd.f32 %v914_v4, %v906_v31  ;;  %v1377_v4 = vld [vmem:[#allocation5] ss:$0 sm:$0xff] }
 0xf7e   :  { %1611 = vtanh.f32 %v916_v32 }
 0xf8b   :  { %v1612_v33 = vpop.eup %1611 }
 0xf8c   :  { %919 = vrot.lane.b32.xlu1 %v1612_v33, %s1679_s22 }
 0xf90   :  { %924 = vrot.lane.b32.xlu1 %v916_v32, %s1681_s3 }
 0xffe   :  { %v920_v34 = vpop.permute.xlu1 %919 }
 0xfff   :  { %v922_v35 = vmul.f32 %v1610_v28, %v920_v34  ;;  %v1375_v28 = vld [vmem:[%s1997_s5] ss:$0 sm:$0xff] }
0x1001   :  { %929 = vrot.lane.b32.xlu0 %v922_v35, %s1680_s23 }
0x1002   :  { %v925_v36 = vpop.permute.xlu1 %924 }
0x1003   :  { %927 = vst.msk [vmem:[#allocation4] sm:$0xff] %vm211_vm0, %v925_v36 }
0x100a   :  { %v1021_v37 = vld [vmem:[#allocation4] sm:$0xff] }
0x100b   :  { %1023 = vrot.lane.b32.xlu1 %v1021_v37, %s1680_s23 }
0x1073   :  { %v930_v38 = vpop.permute.xlu0 %929 }
0x1074   :  { %932 = vst.msk [vmem:[#allocation3] sm:$0xff] %vm211_vm0, %v930_v38 }
0x107b   :  { %v935_v39 = vld [vmem:[#allocation3] sm:$0xff] }
0x107c   :  { %1525 = vmatmul.mubr.msk.f32.vlgmr.msra.gmra.mxu0 %vm211_vm0, %v935_v39 }
0x107d   :  { %1546 = vmatprep.mubr.msk.f32.mxu0 %vm1678_vm1, %v1677_v1  ;;  %v1024_v51 = vpop.permute.xlu1 %1023  ;;  %1539 = vmatpush3.msra.mxu0 %v1177_v20 }
0x107e   :  { %1540 = vmatprep.subr.mxu0 %v1677_v1 }
0x107f   :  { %1541 = vmatpush3.msra.mxu0 %v1176_v21 }
0x1080   :  { %1542 = vmatprep.subr.mxu0 %v1677_v1 }
0x1081   :  { %1543 = vmatpush3.msra.mxu0 %v1175_v22 }
0x1082   :  { %1544 = vmatprep.subr.mxu0 %v1677_v1 }
0x1083   :  { %1545 = vmatpush3.msra.mxu0 %v1174_v3 }
0x113c   :  { %v1009_v41 = vpop.f32.mrf.mxu0 }
0x113d   :  { %v1013_v42 = vadd.f32 %v1009_v41, %v195_v40 }
0x113e   :  { %v1526_v43 = vpop.f32.mrf.mxu0 }
0x113f   :  { %1613 = vtanh.f32 %v1013_v42  ;;  %v1372_v45 = vmul.f32 -1.442695, %v1013_v42 }
0x1141   :  { %1615 = vpow2.f32 %v1372_v45 }
0x114c   :  { %v1614_v44 = vpop.eup %1613 }
0x114d   :  { %1028 = vrot.lane.b32.xlu0 %v1614_v44, %s1679_s22 }
0x114e   :  { %v1616_v46 = vpop.eup %1615 }
0x114f   :  { %v1017_v47 = vadd.f32 1.0, %v1616_v46 }
0x1151   :  { %1617 = vrcp.f32 %v1017_v47 }
0x115e   :  { %v1618_v48 = vpop.eup %1617 }
0x115f   :  { %v1026_v52 = vmul.f32 %v1618_v48, %v1024_v51 }
0x11bf   :  { %v1029_v49 = vpop.permute.xlu0 %1028 }
0x11c0   :  { %v1031_v50 = vmul.f32 %v1618_v48, %v1029_v49 }
0x11c2   :  { %1033 = vrot.lane.b32.xlu0 %v1031_v50, %s1680_s23 }
0x1234   :  { %v1034_v10 = vpop.permute.xlu0 %1033 }
0x1235   :  { %v1036_v53 = vadd.f32 %v1034_v10, %v1026_v52 }
0x1237   :  { %1619 = vtanh.f32 %v1036_v53 }
0x1244   :  { %v1620_v54 = vpop.eup %1619 }
0x1245   :  { %1039 = vrot.lane.b32.xlu1 %v1620_v54, %s1679_s22 }
0x1249   :  { %1044 = vrot.lane.b32.xlu1 %v1036_v53, %s1681_s3 }
0x12b7   :  { %v1040_v55 = vpop.permute.xlu1 %1039 }
0x12b8   :  { %v1042_v56 = vmul.f32 %v1618_v48, %v1040_v55 }
0x12ba   :  { %1049 = vrot.lane.b32.xlu0 %v1042_v56, %s1680_s23 }
0x12bb   :  { %v1045_v57 = vpop.permute.xlu1 %1044 }
0x12bc   :  { %1047 = vst.msk [vmem:[#allocation4] sm:$0xff] %vm211_vm0, %v1045_v57 }
0x12c3   :  { %v1141_v58 = vld [vmem:[#allocation4] sm:$0xff] }
0x12c4   :  { %1143 = vrot.lane.b32.xlu1 %v1141_v58, %s1680_s23 }
0x132c   :  { %v1050_v59 = vpop.permute.xlu0 %1049 }
0x132d   :  { %1052 = vst.msk [vmem:[#allocation3] sm:$0xff] %vm211_vm0, %v1050_v59 }
0x1334   :  { %v1055_v60 = vld [vmem:[#allocation3] sm:$0xff] }
0x1335   :  { %1536 = vmatmul.mubr.msk.f32.vlgmr.msra.gmra.mxu1 %vm211_vm0, %v1055_v60 }
0x1336   :  { %1553 = vmatprep.mubr.msk.f32.mxu1 %vm1678_vm1, %v1677_v1  ;;  %v1144_v17 = vpop.permute.xlu1 %1143  ;;  %1550 = vmatpush3.msra.mxu1 %v1260_v27 }
0x1337   :  { %1551 = vmatprep.subr.mxu1 %v1677_v1 }
0x1338   :  { %1552 = vmatpush3.msra.mxu1 %v1259_v7 }
0x13f5   :  { %v1129_v62 = vpop.f32.mrf.mxu1 }
0x13f6   :  { %v1133_v63 = vadd.f32 %v1129_v62, %v200_v61 }
0x13f7   :  { %v1537_v0 = vpop.f32.mrf.mxu1 }
0x13f8   :  { %1621 = vtanh.f32 %v1133_v63  ;;  %v1374_v12 = vmul.f32 -1.442695, %v1133_v63 }
0x13fa   :  { %1623 = vpow2.f32 %v1374_v12 }
0x1405   :  { %v1622_v2 = vpop.eup %1621 }
0x1406   :  { %1148 = vrot.lane.b32.xlu0 %v1622_v2, %s1679_s22 }
0x1407   :  { %v1624_v13 = vpop.eup %1623 }
0x1408   :  { %v1137_v14 = vadd.f32 1.0, %v1624_v13 }
0x140a   :  { %1625 = vrcp.f32 %v1137_v14 }
0x1417   :  { %v1626_v5 = vpop.eup %1625 }
0x1418   :  { %v1146_v18 = vmul.f32 %v1626_v5, %v1144_v17 }
0x1478   :  { %v1149_v15 = vpop.permute.xlu0 %1148 }
0x1479   :  { %v1151_v16 = vmul.f32 %v1626_v5, %v1149_v15 }
0x147b   :  { %1153 = vrot.lane.b32.xlu0 %v1151_v16, %s1680_s23 }
0x14ed   :  { %v1154_v11 = vpop.permute.xlu0 %1153 }
0x14ee   :  { %v1156_v9 = vadd.f32 %v1154_v11, %v1146_v18 }
0x14f0   :  { %1627 = vtanh.f32 %v1156_v9 }
0x14fd   :  { %v1628_v19 = vpop.eup %1627 }
0x14fe   :  { %1159 = vrot.lane.b32.xlu1 %v1628_v19, %s1679_s22 }
0x1502   :  { %1164 = vrot.lane.b32.xlu1 %v1156_v9, %s1681_s3 }
0x1570   :  { %v1160_v23 = vpop.permute.xlu1 %1159 }
0x1571   :  { %v1162_v24 = vmul.f32 %v1626_v5, %v1160_v23 }
0x1573   :  { %1169 = vrot.lane.b32.xlu0 %v1162_v24, %s1680_s23 }
0x1574   :  { %v1165_v25 = vpop.permute.xlu1 %1164 }
0x1575   :  { %1167 = vst.msk [vmem:[#allocation4] sm:$0xff] %vm211_vm0, %v1165_v25 }
0x15e5   :  { %v1170_v26 = vpop.permute.xlu0 %1169 }
0x15e6   :  { %1172 = vst.msk [vmem:[#allocation3] sm:$0xff] %vm211_vm0, %v1170_v26 }
0x15ed   :  { %v1173_v6 = vld [vmem:[#allocation3] sm:$0xff] }
0x15ee   :  { %1547 = vmatmul.mubr.msk.f32.vlgmr.msra.gmra.mxu0 %vm211_vm0, %v1173_v6 }
0x16ae   :  { %v1254_v29 = vpop.f32.mrf.mxu0 }
0x16af   :  { %v1255_v8 = vadd.f32 %v1375_v28, %v1254_v29 }
0x16b0   :  { %v1548_v30 = vpop.f32.mrf.mxu0 }
0x16b1   :  { %v1258_v31 = vmax.f32 %v1255_v8, 0.0 }
0x16b3   :  { %1554 = vmatmul.mubr.msk.f32.vlgmr.msra.gmra.mxu1 %vm1268_vm3, %v1258_v31 }
0x1773   :  { %v1338_v32 = vpop.f32.mrf.mxu1 }
0x1774   :  { %v1339_v33 = vadd.f32 %v1377_v4, %v1338_v32 }
0x1775   :  { %v1555_v1 = vpop.f32.mrf.mxu1 }
0x1776   :  { %1343 = vst.msk [vmem:[%s2000_s8] sm:$0xff] %vm1342_vm4, %v1339_v33 }
0x1777   :  { %1348 = vsyncpa [#allocation7], 1 }
0x1778   :  { %1349 = vsyncpa [#allocation9], 1 }

</bundles_post_ra>
